<compile_context>
chip_gen: v7x
topology: tpu7x:2x2x1
jax: 0.10.0
libtpu: 0.0.40
codegen_flags: <defaults>
</compile_context>

<pallas_src>
import math
import functools

import jax
import jax.numpy as jnp
from jax import lax
from jax.experimental import pallas as pl
from jax.experimental.pallas import tpu as pltpu


_INV_SQRT2 = 1.0 / math.sqrt(2.0)


def _ffn_kernel(x_ref, w1_ref, b1_ref, w2_ref, b2_ref, o_ref, acc_ref):
    # grid = (M tiles, hidden tiles); hidden is the Linear2 reduction axis.
    #   x_ref  : (tile_m, d_model)   token tile (block index constant over j)
    #   w1_ref : (d_model, tile_h)   W1 column slice
    #   b1_ref : (1, tile_h)         b1 slice (f32)
    #   w2_ref : (tile_h, d_model)   W2 row slice
    #   b2_ref : (1, d_model)        b2 (f32), added only in finalize
    #   o_ref  : (tile_m, d_model)
    #   acc_ref: (tile_m, d_model)   f32 accumulator scratch
    hj = pl.program_id(1)

    @pl.when(hj == 0)
    def _():
        acc_ref[...] = jnp.zeros_like(acc_ref)

    # Linear1 partial (MXU, bf16 inputs -> f32 acc) + bias slice.
    h = jnp.dot(x_ref[...], w1_ref[...],
                preferred_element_type=jnp.float32) + b1_ref[...]

    # Exact GELU (matches torch.nn.GELU() default): 0.5*h*(1+erf(h/sqrt(2))).
    h = 0.5 * h * (1.0 + lax.erf(h * _INV_SQRT2))

    # TODO(synk): training-mode dropout (stateful PRNG + mask) omitted; eval mode is identity.

    # Linear2 partial: accumulate into f32 scratch.
    acc_ref[...] += jnp.dot(h.astype(w2_ref.dtype), w2_ref[...],
                            preferred_element_type=jnp.float32)

    @pl.when(hj == pl.num_programs(1) - 1)
    def _():
        o_ref[...] = (acc_ref[...] + b2_ref[...]).astype(o_ref.dtype)


def _round_up(a, b):
    return (a + b - 1) // b * b


@functools.partial(jax.jit, static_argnames=("tile_m", "tile_h", "compute_dtype"))
def transformer_ffn(x, w1, b1, w2, b2, *, tile_m=512, tile_h=1024,
                    compute_dtype=jnp.bfloat16):
    """Fused FFN forward: Linear1 -> GELU -> (eval Dropout) -> Linear2.

    x:  [batch, seq, d_model]
    w1: [d_model, hidden] (pre-transposed), b1: [hidden]
    w2: [hidden, d_model] (pre-transposed), b2: [d_model]

    tile_m / tile_h defaults are 256-aligned (good for v6e/v7x MXU); use
    tile_m=256 on v5e if VMEM is tight. Tiles are clamped for small problems.
    """
    batch, seq, d_model = x.shape
    hidden = w1.shape[1]
    out_dtype = x.dtype
    m = batch * seq

    # --- tile sizing (keep blocks (8,128)-legal; clamp for tiny problems) ---
    tm = min(tile_m, _round_up(m, 8))
    th = hidden if hidden <= tile_h else tile_h
    m_pad = _round_up(m, tm)
    h_pad = _round_up(hidden, th)

    # --- cast matmul operands to the MXU compute dtype; biases stay f32 ---
    x2d = x.reshape(m, d_model).astype(compute_dtype)
    w1c = w1.astype(compute_dtype)
    w2c = w2.astype(compute_dtype)
    b1_2d = b1.reshape(1, hidden).astype(jnp.float32)
    b2_2d = b2.reshape(1, d_model).astype(jnp.float32)

    # --- zero-pad ragged extents ---
    if m_pad != m:
        x2d = jnp.pad(x2d, ((0, m_pad - m), (0, 0)))
    if h_pad != hidden:
        w1c = jnp.pad(w1c, ((0, 0), (0, h_pad - hidden)))
        b1_2d = jnp.pad(b1_2d, ((0, 0), (0, h_pad - hidden)))
        w2c = jnp.pad(w2c, ((0, h_pad - hidden), (0, 0)))

    grid = (m_pad // tm, h_pad // th)

    out2d = pl.pallas_call(
        _ffn_kernel,
        out_shape=jax.ShapeDtypeStruct((m_pad, d_model), out_dtype),
        grid_spec=pltpu.PrefetchScalarGridSpec(
            num_scalar_prefetch=0,
            grid=grid,
            in_specs=[
                pl.BlockSpec((tm, d_model), lambda i, j: (i, 0)),   # x tile
                pl.BlockSpec((d_model, th), lambda i, j: (0, j)),   # W1 col slice
                pl.BlockSpec((1, th),       lambda i, j: (0, j)),   # b1 slice
                pl.BlockSpec((th, d_model), lambda i, j: (j, 0)),   # W2 row slice
                pl.BlockSpec((1, d_model),  lambda i, j: (0, 0)),   # b2
            ],
            out_specs=pl.BlockSpec((tm, d_model), lambda i, j: (i, 0)),
            scratch_shapes=[pltpu.VMEM((tm, d_model), jnp.float32)],
        ),
        compiler_params=pltpu.CompilerParams(
            dimension_semantics=("parallel", "arbitrary"),
        ),
    )(x2d, w1c, b1_2d, w2c, b2_2d)

    if m_pad != m:
        out2d = out2d[:m]
    return out2d.reshape(batch, seq, d_model)


def init_params(key, d_model, hidden_dim, dtype=jnp.float32):
    """Deterministic init mimicking nn.Linear (uniform +/- 1/sqrt(fan_in)).

    Weights are stored pre-transposed: w1 [d_model, hidden], w2 [hidden, d_model].
    """
    k1, k2, k3, k4 = jax.random.split(key, 4)
    bound1 = 1.0 / math.sqrt(d_model)
    bound2 = 1.0 / math.sqrt(hidden_dim)
    w1 = jax.random.uniform(k1, (d_model, hidden_dim), dtype, -bound1, bound1)
    b1 = jax.random.uniform(k2, (hidden_dim,), dtype, -bound1, bound1)
    w2 = jax.random.uniform(k3, (hidden_dim, d_model), dtype, -bound2, bound2)
    b2 = jax.random.uniform(k4, (d_model,), dtype, -bound2, bound2)
    return w1, b1, w2, b2


if __name__ == "__main__":
    key = jax.random.PRNGKey(0)
    batch, seq, d_model, hidden_dim = 2, 8, 32, 64

    kx, kp = jax.random.split(key)
    x = jax.random.normal(kx, (batch, seq, d_model), jnp.float32)
    w1, b1, w2, b2 = init_params(kp, d_model, hidden_dim)

    out = transformer_ffn(x, w1, b1, w2, b2)
    out = jax.block_until_ready(out)

    # Pure-JAX reference matching the kernel's numerics (bf16 MXU operands,
    # f32 accumulation, f32 bias/GELU).
    def ref(x):
        xb = x.reshape(-1, d_model).astype(jnp.bfloat16)
        h = jnp.dot(xb, w1.astype(jnp.bfloat16),
                    preferred_element_type=jnp.float32) + b1
        h = 0.5 * h * (1.0 + lax.erf(h / math.sqrt(2.0)))
        y = jnp.dot(h.astype(jnp.bfloat16), w2.astype(jnp.bfloat16),
                    preferred_element_type=jnp.float32) + b2
        return y.reshape(batch, seq, d_model).astype(x.dtype)

    expected = ref(x)
    assert out.shape == (batch, seq, d_model)
    assert jnp.allclose(out, expected, atol=2e-2, rtol=2e-2), (
        float(jnp.max(jnp.abs(out - expected))))

    print("KERNEL_OK")
</pallas_src>

<mosaic_0001>
module attributes {stable_mosaic.version = 11 : i64} {
  func.func @_ffn_kernel(%arg0: i32, %arg1: i32, %arg2: memref<16x32xbf16, #tpu.memory_space<vmem>>, %arg3: memref<32x64xbf16, #tpu.memory_space<vmem>>, %arg4: memref<1x64xf32, #tpu.memory_space<vmem>>, %arg5: memref<64x32xbf16, #tpu.memory_space<vmem>>, %arg6: memref<1x32xf32, #tpu.memory_space<vmem>>, %arg7: memref<16x32xf32, #tpu.memory_space<vmem>>, %arg8: memref<16x32xf32, #tpu.memory_space<vmem>>) attributes {dimension_semantics = [#tpu.dimension_semantics<parallel>, #tpu.dimension_semantics<arbitrary>], iteration_bounds = array<i64: 1, 1>, scalar_prefetch = 0 : i64, scratch_operands = 1 : i64, tpu.core_type = #tpu.core_type<tc>, window_params = [{transform_indices = @transform_0, window_bounds = array<i64: 16, 32>}, {transform_indices = @transform_1, window_bounds = array<i64: 32, 64>}, {transform_indices = @transform_2, window_bounds = array<i64: 1, 64>}, {transform_indices = @transform_3, window_bounds = array<i64: 64, 32>}, {pipeline_mode = #tpu.pipeline_mode<synchronous>, transform_indices = @transform_4, window_bounds = array<i64: 1, 32>}, {transform_indices = @transform_5, window_bounds = array<i64: 16, 32>}]} {
    %c0_i32 = arith.constant 0 : i32
    %0 = arith.cmpi eq, %arg1, %c0_i32 : i32
    %1 = arith.extui %0 : i1 to i32
    %c0_i32_0 = arith.constant 0 : i32
    %2 = arith.cmpi ne, %1, %c0_i32_0 : i32
    scf.if %2 {
      %cst_18 = arith.constant 0.000000e+00 : f32
      %26 = vector.broadcast %cst_18 : f32 to vector<16x32xf32>
      %c0_19 = arith.constant 0 : index
      %c0_20 = arith.constant 0 : index
      %27 = vector.load %arg8[%c0_19, %c0_20] : memref<16x32xf32, #tpu.memory_space<vmem>>, vector<16x32xf32>
      tpu.vector_store %arg8[%c0_19, %c0_20], %26 {strides = array<i32>} : memref<16x32xf32, #tpu.memory_space<vmem>>, vector<16x32xf32>,
    } else {
    }
    %c0 = arith.constant 0 : index
    %c0_1 = arith.constant 0 : index
    %3 = vector.load %arg2[%c0, %c0_1] : memref<16x32xbf16, #tpu.memory_space<vmem>>, vector<16x32xbf16>
    %c0_2 = arith.constant 0 : index
    %c0_3 = arith.constant 0 : index
    %4 = vector.load %arg3[%c0_2, %c0_3] : memref<32x64xbf16, #tpu.memory_space<vmem>>, vector<32x64xbf16>
    %cst = arith.constant dense<0.000000e+00> : vector<16x64xf32>
    %5 = tpu.matmul %3, %4, %cst {dimension_numbers = #tpu.dot_dimension_numbers<[1], [0], [0], [1], [0, 0, 1, 1], [], []>} : vector<16x32xbf16>, vector<32x64xbf16>, vector<16x64xf32> -> vector<16x64xf32>
    %c0_4 = arith.constant 0 : index
    %c0_5 = arith.constant 0 : index
    %6 = vector.load %arg4[%c0_4, %c0_5] : memref<1x64xf32, #tpu.memory_space<vmem>>, vector<1x64xf32>
    %7 = vector.broadcast %6 : vector<1x64xf32> to vector<16x64xf32>
    %8 = arith.addf %5, %7 : vector<16x64xf32>
    %cst_6 = arith.constant 5.000000e-01 : f32
    %9 = vector.broadcast %cst_6 : f32 to vector<16x64xf32>
    %10 = arith.mulf %9, %8 : vector<16x64xf32>
    %cst_7 = arith.constant 0.707106769 : f32
    %11 = vector.broadcast %cst_7 : f32 to vector<16x64xf32>
    %12 = arith.mulf %8, %11 : vector<16x64xf32>
    %13 = math.erf %12 : vector<16x64xf32>
    %cst_8 = arith.constant 1.000000e+00 : f32
    %14 = vector.broadcast %cst_8 : f32 to vector<16x64xf32>
    %15 = arith.addf %14, %13 : vector<16x64xf32>
    %16 = arith.mulf %10, %15 : vector<16x64xf32>
    %c0_9 = arith.constant 0 : index
    %c0_10 = arith.constant 0 : index
    %17 = vector.load %arg8[%c0_9, %c0_10] : memref<16x32xf32, #tpu.memory_space<vmem>>, vector<16x32xf32>
    %18 = arith.truncf %16 : vector<16x64xf32> to vector<16x64xbf16>
    %c0_11 = arith.constant 0 : index
    %c0_12 = arith.constant 0 : index
    %19 = vector.load %arg5[%c0_11, %c0_12] : memref<64x32xbf16, #tpu.memory_space<vmem>>, vector<64x32xbf16>
    %cst_13 = arith.constant dense<0.000000e+00> : vector<16x32xf32>
    %20 = tpu.matmul %18, %19, %cst_13 {dimension_numbers = #tpu.dot_dimension_numbers<[1], [0], [0], [1], [0, 0, 1, 1], [], []>} : vector<16x64xbf16>, vector<64x32xbf16>, vector<16x32xf32> -> vector<16x32xf32>
    %21 = arith.addf %17, %20 : vector<16x32xf32>
    %c0_14 = arith.constant 0 : index
    %c0_15 = arith.constant 0 : index
    %22 = vector.load %arg8[%c0_14, %c0_15] : memref<16x32xf32, #tpu.memory_space<vmem>>, vector<16x32xf32>
    tpu.vector_store %arg8[%c0_14, %c0_15], %21 {strides = array<i32>} : memref<16x32xf32, #tpu.memory_space<vmem>>, vector<16x32xf32>,
    %c0_i32_16 = arith.constant 0 : i32
    %23 = arith.cmpi eq, %arg1, %c0_i32_16 : i32
    %24 = arith.extui %23 : i1 to i32
    %c0_i32_17 = arith.constant 0 : i32
    %25 = arith.cmpi ne, %24, %c0_i32_17 : i32
    scf.if %25 {
      %c0_18 = arith.constant 0 : index
      %c0_19 = arith.constant 0 : index
      %26 = vector.load %arg8[%c0_18, %c0_19] : memref<16x32xf32, #tpu.memory_space<vmem>>, vector<16x32xf32>
      %c0_20 = arith.constant 0 : index
      %c0_21 = arith.constant 0 : index
      %27 = vector.load %arg6[%c0_20, %c0_21] : memref<1x32xf32, #tpu.memory_space<vmem>>, vector<1x32xf32>
      %28 = vector.broadcast %27 : vector<1x32xf32> to vector<16x32xf32>
      %29 = arith.addf %26, %28 : vector<16x32xf32>
      %c0_22 = arith.constant 0 : index
      %c0_23 = arith.constant 0 : index
      %30 = vector.load %arg7[%c0_22, %c0_23] : memref<16x32xf32, #tpu.memory_space<vmem>>, vector<16x32xf32>
      tpu.vector_store %arg7[%c0_22, %c0_23], %29 {strides = array<i32>} : memref<16x32xf32, #tpu.memory_space<vmem>>, vector<16x32xf32>,
    } else {
    }
    return
  }
  func.func @transform_0(%arg0: i32, %arg1: i32) -> (i32, i32) {
    %c0_i32 = arith.constant 0 : i32
    %c0_i32_0 = arith.constant 0 : i32
    return %arg0, %c0_i32 : i32, i32
  }
  func.func @transform_1(%arg0: i32, %arg1: i32) -> (i32, i32) {
    %c0_i32 = arith.constant 0 : i32
    %c0_i32_0 = arith.constant 0 : i32
    return %c0_i32, %arg1 : i32, i32
  }
  func.func @transform_2(%arg0: i32, %arg1: i32) -> (i32, i32) {
    %c0_i32 = arith.constant 0 : i32
    %c0_i32_0 = arith.constant 0 : i32
    return %c0_i32, %arg1 : i32, i32
  }
  func.func @transform_3(%arg0: i32, %arg1: i32) -> (i32, i32) {
    %c0_i32 = arith.constant 0 : i32
    %c0_i32_0 = arith.constant 0 : i32
    return %arg1, %c0_i32 : i32, i32
  }
  func.func @transform_4(%arg0: i32, %arg1: i32) -> (i32, i32) {
    %c0_i32 = arith.constant 0 : i32
    %c0_i32_0 = arith.constant 0 : i32
    %c0_i32_1 = arith.constant 0 : i32
    return %c0_i32, %c0_i32_0 : i32, i32
  }
  func.func @transform_5(%arg0: i32, %arg1: i32) -> (i32, i32) {
    %c0_i32 = arith.constant 0 : i32
    %c0_i32_0 = arith.constant 0 : i32
    return %arg0, %c0_i32 : i32, i32
  }
}

</mosaic_0001>

<bundles_post_ra>
// kernel: transformer_ffn.1
= control target key start
LH: loop header
LB: loop body
LE: loop exit
PB: predicated region body
PF: predicated region fallthrough
CT: control target
= control target key end

     0   :  { %v309_v1 = vmov 0.0   ;;  %vm310_vm0 = vmmov 0   ;;  %vm26_vm1 = vcmask 261120   ;;  %s390_s0 = inlined_call_operand.vmem [shape: bf16[16,32], index: 0, kind: input, shape index: {}]   ;;  %s391_s1 = inlined_call_operand.vmem [shape: bf16[32,64], index: 1, kind: input, shape index: {}]   ;;  %s392_s2 = inlined_call_operand.vmem [shape: f32[1,64], index: 2, kind: input, shape index: {}]   ;;  %s393_s3 = inlined_call_operand.vmem [shape: bf16[64,32], index: 3, kind: input, shape index: {}]   ;;  %s394_s4 = inlined_call_operand.vmem [shape: f32[1,32], index: 4, kind: input, shape index: {}]   ;;  %s395_s5 = inlined_call_operand.hbm [shape: f32[16,32], index: 5, kind: output, shape index: {}]  }
   0x1   :  { %v274_v0 = vld [vmem:[%s391_s1] sm:$0xff]   ;;  %249 = vmatprep.subr.bf16.mxu0 %v309_v1  ;;  %257 = vmatprep.subr.bf16.mxu1 %v309_v1  ;;  %v275_v2 = vld [vmem:[%s391_s1 + $0x8] sm:$0xff]   ;;  %27 = vst.msk [vmem:[#allocation2] sm:$0xff] %vm26_vm1, %v309_v1  ;;  %28 = vst.msk [vmem:[#allocation2 + $0x8] sm:$0xff] %vm26_vm1, %v309_v1 }
   0x2   :  { %250 = vmatpush3.bf16.msra.mxu0 %v274_v0  ;;  %253 = vmatprep.mubr.msk.bf16.mxu0 %vm310_vm0, %v309_v1  ;;  %v276_v3 = vld [vmem:[%s390_s0] sm:$0xff]  }
   0x3   :  { %251 = vmatprep.subr.bf16.mxu0 %v309_v1  ;;  %265 = vmatprep.mubr.msk.bf16.mxu1 %vm310_vm0, %v309_v1 }
   0x6   :  { %252 = vmatpush3.bf16.msra.mxu0 %v275_v2 }
   0x7   :  { %10 = vsyncpa [#allocation4], 0  ;;  %v277_v4 = vld [vmem:[%s393_s3] sm:$0xff]   ;;  %v278_v5 = vld [vmem:[%s393_s3 + $0x8] sm:$0xff]   ;;  %vm149_vm2 = vcmask 523264   ;;  %s311_s7 = smov [#allocation3]  }
   0x8   :  { %258 = vmatpush3.bf16.msra.mxu1 %v277_v4  ;;  %v279_v6 = vld [vmem:[%s393_s3 + $0x10] sm:$0xff]   ;;  %v280_v7 = vld [vmem:[%s393_s3 + $0x18] sm:$0xff]   ;;  %v230_v8 = vld [vmem:[%s392_s2] ss:$0 sm:$0xff]  ;;  %s219_s8 = sshll.u32 %s311_s7, 4  ;;  %s220_s8 = int_to_ptr.vmem [resolvable:$true] %s219_s8 }
   0x9   :  { %254 = vmatmul.mubr.msk.bf16.vlgmr.msra.gmra.mrb[0].mxu0 %vm26_vm1, %v276_v3  ;;  %259 = vmatprep.subr.bf16.mxu1 %v309_v1  ;;  %v114_v26 = vld [vmem:[#allocation2] sm:$0xff]  ;;  %v115_v28 = vld [vmem:[#allocation2 + $0x8] sm:$0xff]  ;;  %s285_s9 = scalar_lea.vmem %s220_s8, 256  ;;  %p290_p1 = scmp.lt.s32.totalorder %s220_s8, %s220_s8 }
   0xa   :  { %v240_v34 = vld [vmem:[%s394_s4] ss:$0 sm:$0xff]  ;;  %p286_p0 = scmp.ne.s32.totalorder %s220_s8, %s285_s9  ;;  %p291_p2 = scmp.lt.s32.totalorder %s285_s9, %s285_s9 }
   0xc   :  { %260 = vmatpush3.bf16.msra.mxu1 %v278_v5  ;;  %p292_p3 = por %p291_p2, %p290_p1 }
   0xd   :  { %261 = vmatprep.subr.bf16.mxu1 %v309_v1 }
   0xe   :  { %p293_p4 = pnand %p292_p3, %p286_p0 }
  0x10   :  { %262 = vmatpush3.bf16.msra.mxu1 %v279_v6 }
  0x11   :  { %263 = vmatprep.subr.bf16.mxu1 %v309_v1 }
  0x14   :  { %264 = vmatpush3.bf16.msra.mxu1 %v280_v7 }
  0xdc   :  { %v97_v9 = vpop.f32.mrb[0].mxu0 }
  0xdd   :  { %v98_v10 = vadd.f32 %v230_v8, %v97_v9  ;;  %v255_v11 = vpop.f32.mrb[1].mxu0 }
  0xde   :  { %v100_v12 = vpop.f32.mrb[2].mxu0 }
  0xdf   :  { %v106_v13 = vmul.f32 0.70710677, %v98_v10  ;;  %v101_v14 = vadd.f32 %v230_v8, %v100_v12  ;;  %v256_v15 = vpop.f32.mrb[3].mxu0  ;;  %v104_v20 = vmul.f32 0.5, %v98_v10 }
  0xe1   :  { %281 = verf.f32 %v106_v13  ;;  %v107_v16 = vmul.f32 0.70710677, %v101_v14  ;;  %v105_v21 = vmul.f32 0.5, %v101_v14 }
  0xe3   :  { %283 = verf.f32 %v107_v16 }
  0xeb   :  { %v282_v17 = vpop.eup %281 }
  0xec   :  { %v110_v18 = vadd.f32 1.0, %v282_v17 }
  0xed   :  { %v284_v19 = vpop.eup %283 }
  0xee   :  { %v111_v22 = vadd.f32 1.0, %v284_v19  ;;  %v112_v23 = vmul.f32 %v110_v18, %v104_v20 }
  0xf0   :  { %v113_v24 = vmul.f32 %v111_v22, %v105_v21 }
  0xf2   :  { %v116_v25 = vpack.c.bf16 %v113_v24, %v112_v23 }
  0xf4   :  { %266 = vmatmul.mubr.msk.bf16.vlgmr.msra.gmra.mrb[0].mxu1 %vm149_vm2, %v116_v25 }
 0x1c7   :  { %v187_v27 = vpop.f32.mrb[0].mxu1 }
 0x1c8   :  { %v194_v29 = vadd.f32 %v187_v27, %v114_v26  ;;  %v267_v30 = vpop.f32.mrb[1].mxu1 }
 0x1c9   :  { %v190_v31 = vpop.f32.mrb[2].mxu1 }
 0x1ca   :  { %196 = vst.msk [vmem:[#allocation2] sm:$0xff] %vm26_vm1, %v194_v29  ;;  %v195_v32 = vadd.f32 %v190_v31, %v115_v28  ;;  %v268_v33 = vpop.f32.mrb[3].mxu1 }
 0x1cc   :  { %197 = vst.msk [vmem:[#allocation2 + $0x8] sm:$0xff] %vm26_vm1, %v195_v32 }
 0x1d1   :  { %v201_v35 = vld [vmem:[#allocation2] sm:$0xff] }
 0x1d2   :  { %v210_v36 = vadd.f32 %v240_v34, %v201_v35 }
 0x1d3   :  { %v202_v37 = vld [vmem:[#allocation2 + $0x8] sm:$0xff] }
 0x1d4   :  { %v211_v38 = vadd.f32 %v240_v34, %v202_v37  ;;  %212 = vst.msk [vmem:[#allocation3] sm:$0xff] %vm26_vm1, %v210_v36 }
 0x1d6   :  { %213 = vst.msk [vmem:[#allocation3 + $0x8] sm:$0xff] %vm26_vm1, %v211_v38 }
 0x1d7   :  { %296 = shalt.err (!%p293_p4)
}
 0x1d8   :  { %s297_s11 = scalar_lea.hbm %s395_s5, 256 }
 0x1d9   :  { %p298_p5 = scmp.ne.s32.totalorder %s395_s5, %s297_s11  ;;  %p301_p6 = scmp.lt.u32.totalorder %s297_s11, %s395_s5 }
 0x1db   :  { %p303_p7 = pnand %p301_p6, %p298_p5 }
 0x1dd   :  { %306 = shalt.err (!%p303_p7)
}
 0x1de   :  { %s312_s16 = smov 128   ;;  %s313_s17 = smov 8  }
 0x1df   :  { %225 = dma.vmem_to_hbm [thread:$0]  %s220_s8, 256, %s395_s5, [#allocation4], %s312_s16, %s312_s16, %s313_s17  }
 0x1e0   :  { %307 = dma.done.wait [#allocation4], 256  }
 0x1e1   :  { %308 = vsyncadd [#allocation4], 4294967040 }
 0x1e2   :  { %229 = vsyncpa [#allocation4], 1 }

</bundles_post_ra>
